<compile_context>
chip_gen: v7x
topology: tpu7x:2x2x1
jax: 0.10.0
libtpu: 0.0.40
codegen_flags: <defaults>
</compile_context>

<pallas_src>
import jax
import jax.numpy as jnp
from jax.experimental import pallas as pl
from jax.experimental.pallas import tpu as pltpu

_EPS = 1e-5  # PyTorch BatchNorm1d default eps
_VMEM_BUDGET = 20 * 1024 * 1024  # per-step working-set cap (headroom under v7x limits)


def _bn_relu(h, gamma, beta, n_inv):
    """Training-mode BatchNorm1d (+ReLU) on h:(B,T,H); per-channel stats over (B,H).

    Single pass over h (sum and sum-of-squares together), affine folded into a
    single per-channel scale/shift.  gamma/beta are (1, T, 1) f32.
    """
    s1 = jnp.sum(h, axis=(0, 2), keepdims=True)        # (1, T, 1)
    s2 = jnp.sum(h * h, axis=(0, 2), keepdims=True)    # (1, T, 1)
    mean = s1 * n_inv
    var = jnp.maximum(s2 * n_inv - mean * mean, 0.0)   # clamp cancellation
    scale = gamma * jax.lax.rsqrt(var + _EPS)          # EUP rsqrt (free slot)
    shift = beta - mean * scale
    return jnp.maximum(h * scale + shift, 0.0)


def residual_block_kernel(x_ref, w1_ref, w2_ref, p_ref, o_ref):
    B, T, D = x_ref.shape                  # T = channel tile of R
    H = w1_ref.shape[1]
    n_inv = 1.0 / (B * H)

    # fc1: Linear(bias=False) on the MXU.  (B,T,D)->(B*T,D) keeps the lane dim
    # and T%8==0, so the collapse is a relayout-free 2-D view; cast to bf16
    # only for the matmul operands (full-rate MXU path on v5e/v6e/v7x).
    x2 = x_ref[...].reshape(B * T, D).astype(jnp.bfloat16)
    h1 = jnp.dot(x2, w1_ref[...], preferred_element_type=jnp.float32)
    h1 = _bn_relu(h1.reshape(B, T, H), p_ref[0], p_ref[1], n_inv)   # f32 BN + ReLU

    # fc2: Linear(bias=False) + BN + ReLU.
    h2 = jnp.dot(h1.reshape(B * T, H).astype(jnp.bfloat16), w2_ref[...],
                 preferred_element_type=jnp.float32)
    h2 = _bn_relu(h2.reshape(B, T, H), p_ref[2], p_ref[3], n_inv)

    # Residual add (downsample is None -> identity) + final ReLU, in f32.
    # Re-read the VMEM-resident input tile instead of keeping a copy live
    # across both matmuls/BN passes (vector-load slots have slack).
    # TODO(synk): arbitrary `downsample` nn.Module is not implemented (None by default).
    # TODO(synk): running_mean/running_var buffer updates are not emulated (forward only).
    out = jnp.maximum(h2 + x_ref[...].astype(jnp.float32), 0.0)
    o_ref[...] = out.astype(o_ref.dtype)


def _step_vmem_bytes(B, tr, D, H, x_itemsize):
    io = 2 * (B * tr * D * x_itemsize) * 2        # x block + out block, double-buffered
    weights = (D * H + H * H) * 2 * 2             # bf16 weights, double-buffered
    interm = 3 * (B * tr * H) * 4                 # h1 / h*h / h2 f32 temporaries
    return io + weights + interm


def _choose_tr(B, R, D, H, x_itemsize):
    """Channel tile: fill the MXU (M = B*tr >= 256) while bounding VMEM and,
    when cheap, keeping a >= 2-step parallel grid for v7x's two TensorCores."""
    if R % 8 != 0:
        return R
    divisors = [t for t in range(8, R + 1, 8) if R % t == 0]
    if not divisors:
        return R
    good = [t for t in divisors if B * t >= 256]
    tr = min(good) if good else max(divisors)
    if R // tr < 2:
        two_step = [t for t in divisors if R // t >= 2 and B * t >= 128]
        if two_step:
            tr = max(two_step)
    while _step_vmem_bytes(B, tr, D, H, x_itemsize) > _VMEM_BUDGET:
        smaller = [t for t in divisors if t < tr]
        if not smaller:
            break
        tr = max(smaller)
    return tr


def residual_block(x, w1_t, g1, b1, w2_t, g2, b2, *, tr=None):
    """x: (B, R, D); w*_t: (in, out) = transposed PyTorch Linear weights;
    g*, b*: (R,) BatchNorm1d affine params."""
    B, R, D = x.shape
    H = w1_t.shape[1]
    assert w1_t.shape == (D, H) and w2_t.shape == (H, H)
    assert H == D, "identity residual needs output_dim == input_dim (downsample=None)"

    if tr is None:
        tr = _choose_tr(B, R, D, H, x.dtype.itemsize)
    assert R % tr == 0

    # bf16 weights for the MXU (halves weight DMA bytes); x stays in its
    # native dtype so the residual add is full precision.
    w1_b = w1_t.astype(jnp.bfloat16)
    w2_b = w2_t.astype(jnp.bfloat16)

    # Pack the four BN param vectors into one (4, 1, R, 1) f32 tile: a single
    # small DMA per grid step instead of four lane-masked ones.
    params = jnp.stack([g1, b1, g2, b2]).astype(jnp.float32).reshape(4, 1, R, 1)

    chan_spec = pl.BlockSpec((B, tr, D), lambda i: (0, i, 0))
    w1_spec = pl.BlockSpec((D, H), lambda i: (0, 0))   # VMEM-resident across grid
    w2_spec = pl.BlockSpec((H, H), lambda i: (0, 0))
    p_spec = pl.BlockSpec((4, 1, tr, 1), lambda i: (0, 0, i, 0))

    grid_spec = pltpu.PrefetchScalarGridSpec(
        num_scalar_prefetch=0,
        grid=(R // tr,),
        in_specs=[chan_spec, w1_spec, w2_spec, p_spec],
        out_specs=chan_spec,
    )
    return pl.pallas_call(
        residual_block_kernel,
        out_shape=jax.ShapeDtypeStruct((B, R, D), x.dtype),
        grid_spec=grid_spec,
        compiler_params=pltpu.CompilerParams(
            dimension_semantics=("parallel",),
            vmem_limit_bytes=32 * 1024 * 1024),
    )(x, w1_b, w2_b, params)


def reference(x, w1_t, g1, b1, w2_t, g2, b2):
    def mm(a, w):  # match the kernel's bf16-operand / f32-accumulate MXU path
        return jnp.dot(a.astype(jnp.bfloat16), w.astype(jnp.bfloat16),
                       preferred_element_type=jnp.float32)

    def bn(h, g, bta):
        mean = h.mean(axis=(0, 2), keepdims=True)
        var = ((h - mean) ** 2).mean(axis=(0, 2), keepdims=True)
        return (h - mean) * jax.lax.rsqrt(var + _EPS) * g[None, :, None] + bta[None, :, None]

    h1 = jax.nn.relu(bn(mm(x, w1_t), g1, b1))
    h2 = jax.nn.relu(bn(mm(h1, w2_t), g2, b2))
    return jax.nn.relu(h2 + x.astype(jnp.float32)).astype(x.dtype)


if __name__ == "__main__":
    # Small but TPU-friendly shapes: lane-dense feature dim (D = 128), channel
    # axis R a multiple of 8.
    B, R, D = 8, 16, 128       # batch, running_elems (BN channels), feature dim
    key = jax.random.PRNGKey(0)
    kx, k1, k2, kg1, kb1, kg2, kb2 = jax.random.split(key, 7)

    x = jax.random.normal(kx, (B, R, D), dtype=jnp.float32)
    # PyTorch Linear weight is (out, in); we pass the transpose (in, out).
    w1_t = jax.random.normal(k1, (D, D), dtype=jnp.float32) * (D ** -0.5)
    w2_t = jax.random.normal(k2, (D, D), dtype=jnp.float32) * (D ** -0.5)
    g1 = 1.0 + 0.1 * jax.random.normal(kg1, (R,), dtype=jnp.float32)
    b1 = 0.1 * jax.random.normal(kb1, (R,), dtype=jnp.float32)
    g2 = 1.0 + 0.1 * jax.random.normal(kg2, (R,), dtype=jnp.float32)
    b2 = 0.1 * jax.random.normal(kb2, (R,), dtype=jnp.float32)

    out = residual_block(x, w1_t, g1, b1, w2_t, g2, b2)
    out = jax.block_until_ready(out)

    ref = reference(x, w1_t, g1, b1, w2_t, g2, b2)
    assert out.shape == (B, R, D)
    # bf16 MXU operands in both kernel and reference; remaining diff is BN
    # one-pass vs two-pass variance -> loose-ish tolerance.
    assert jnp.allclose(out, ref, atol=5e-3, rtol=5e-3), "mismatch vs JAX reference"
    print("KERNEL_OK")
</pallas_src>

<mosaic_0001>
module attributes {stable_mosaic.version = 11 : i64} {
  func.func @residual_block_kernel(%arg0: i32, %arg1: memref<8x16x128xf32, #tpu.memory_space<vmem>>, %arg2: memref<128x128xbf16, #tpu.memory_space<vmem>>, %arg3: memref<128x128xbf16, #tpu.memory_space<vmem>>, %arg4: memref<4x1x16x1xf32, #tpu.memory_space<vmem>>, %arg5: memref<8x16x128xf32, #tpu.memory_space<vmem>>) attributes {dimension_semantics = [#tpu.dimension_semantics<parallel>], iteration_bounds = array<i64: 1>, scalar_prefetch = 0 : i64, scratch_operands = 0 : i64, tpu.core_type = #tpu.core_type<tc>, window_params = [{transform_indices = @transform_0, window_bounds = array<i64: 8, 16, 128>}, {pipeline_mode = #tpu.pipeline_mode<synchronous>, transform_indices = @transform_1, window_bounds = array<i64: 128, 128>}, {pipeline_mode = #tpu.pipeline_mode<synchronous>, transform_indices = @transform_2, window_bounds = array<i64: 128, 128>}, {transform_indices = @transform_3, window_bounds = array<i64: 4, 1, 16, 1>}, {transform_indices = @transform_4, window_bounds = array<i64: 8, 16, 128>}]} {
    %c0 = arith.constant 0 : index
    %c0_0 = arith.constant 0 : index
    %c0_1 = arith.constant 0 : index
    %0 = vector.load %arg1[%c0, %c0_0, %c0_1] : memref<8x16x128xf32, #tpu.memory_space<vmem>>, vector<8x16x128xf32>
    %1 = vector.shape_cast %0 : vector<8x16x128xf32> to vector<128x128xf32>
    %2 = arith.truncf %1 : vector<128x128xf32> to vector<128x128xbf16>
    %c0_2 = arith.constant 0 : index
    %c0_3 = arith.constant 0 : index
    %3 = vector.load %arg2[%c0_2, %c0_3] : memref<128x128xbf16, #tpu.memory_space<vmem>>, vector<128x128xbf16>
    %cst = arith.constant dense<0.000000e+00> : vector<128x128xf32>
    %4 = tpu.matmul %2, %3, %cst {dimension_numbers = #tpu.dot_dimension_numbers<[1], [0], [0], [1], [0, 0, 1, 1], [], []>} : vector<128x128xbf16>, vector<128x128xbf16>, vector<128x128xf32> -> vector<128x128xf32>
    %5 = vector.shape_cast %4 : vector<128x128xf32> to vector<8x16x128xf32>
    %c0_4 = arith.constant 0 : index
    %c0_5 = arith.constant 0 : index
    %c0_6 = arith.constant 0 : index
    %c0_7 = arith.constant 0 : index
    %6 = vector.load %arg4[%c0_4, %c0_5, %c0_6, %c0_7] : memref<4x1x16x1xf32, #tpu.memory_space<vmem>>, vector<1x1x16x1xf32>
    %7 = vector.shape_cast %6 : vector<1x1x16x1xf32> to vector<1x16x1xf32>
    %c1 = arith.constant 1 : index
    %c0_8 = arith.constant 0 : index
    %c0_9 = arith.constant 0 : index
    %c0_10 = arith.constant 0 : index
    %8 = vector.load %arg4[%c1, %c0_8, %c0_9, %c0_10] : memref<4x1x16x1xf32, #tpu.memory_space<vmem>>, vector<1x1x16x1xf32>
    %9 = vector.shape_cast %8 : vector<1x1x16x1xf32> to vector<1x16x1xf32>
    %cst_11 = arith.constant dense<0.000000e+00> : vector<16xf32>
    %10 = vector.multi_reduction <add>, %5, %cst_11 [0, 2] : vector<8x16x128xf32> to vector<16xf32>
    %11 = vector.shape_cast %10 : vector<16xf32> to vector<1x16x1xf32>
    %12 = arith.mulf %5, %5 : vector<8x16x128xf32>
    %cst_12 = arith.constant dense<0.000000e+00> : vector<16xf32>
    %13 = vector.multi_reduction <add>, %12, %cst_12 [0, 2] : vector<8x16x128xf32> to vector<16xf32>
    %14 = vector.shape_cast %13 : vector<16xf32> to vector<1x16x1xf32>
    %cst_13 = arith.constant 9.765625E-4 : f32
    %15 = vector.broadcast %cst_13 : f32 to vector<1x16x1xf32>
    %16 = arith.mulf %11, %15 : vector<1x16x1xf32>
    %cst_14 = arith.constant 9.765625E-4 : f32
    %17 = vector.broadcast %cst_14 : f32 to vector<1x16x1xf32>
    %18 = arith.mulf %14, %17 : vector<1x16x1xf32>
    %19 = arith.mulf %16, %16 : vector<1x16x1xf32>
    %20 = arith.subf %18, %19 : vector<1x16x1xf32>
    %cst_15 = arith.constant 0.000000e+00 : f32
    %21 = vector.broadcast %cst_15 : f32 to vector<1x16x1xf32>
    %22 = arith.maximumf %20, %21 : vector<1x16x1xf32>
    %cst_16 = arith.constant 9.99999974E-6 : f32
    %23 = vector.broadcast %cst_16 : f32 to vector<1x16x1xf32>
    %24 = arith.addf %22, %23 : vector<1x16x1xf32>
    %25 = math.rsqrt %24 : vector<1x16x1xf32>
    %26 = arith.mulf %7, %25 : vector<1x16x1xf32>
    %27 = arith.mulf %16, %26 : vector<1x16x1xf32>
    %28 = arith.subf %9, %27 : vector<1x16x1xf32>
    %29 = vector.broadcast %26 : vector<1x16x1xf32> to vector<8x16x128xf32>
    %30 = arith.mulf %5, %29 : vector<8x16x128xf32>
    %31 = vector.broadcast %28 : vector<1x16x1xf32> to vector<8x16x128xf32>
    %32 = arith.addf %30, %31 : vector<8x16x128xf32>
    %cst_17 = arith.constant 0.000000e+00 : f32
    %33 = vector.broadcast %cst_17 : f32 to vector<8x16x128xf32>
    %34 = arith.maximumf %32, %33 : vector<8x16x128xf32>
    %35 = vector.shape_cast %34 : vector<8x16x128xf32> to vector<128x128xf32>
    %36 = arith.truncf %35 : vector<128x128xf32> to vector<128x128xbf16>
    %c0_18 = arith.constant 0 : index
    %c0_19 = arith.constant 0 : index
    %37 = vector.load %arg3[%c0_18, %c0_19] : memref<128x128xbf16, #tpu.memory_space<vmem>>, vector<128x128xbf16>
    %cst_20 = arith.constant dense<0.000000e+00> : vector<128x128xf32>
    %38 = tpu.matmul %36, %37, %cst_20 {dimension_numbers = #tpu.dot_dimension_numbers<[1], [0], [0], [1], [0, 0, 1, 1], [], []>} : vector<128x128xbf16>, vector<128x128xbf16>, vector<128x128xf32> -> vector<128x128xf32>
    %39 = vector.shape_cast %38 : vector<128x128xf32> to vector<8x16x128xf32>
    %c2 = arith.constant 2 : index
    %c0_21 = arith.constant 0 : index
    %c0_22 = arith.constant 0 : index
    %c0_23 = arith.constant 0 : index
    %40 = vector.load %arg4[%c2, %c0_21, %c0_22, %c0_23] : memref<4x1x16x1xf32, #tpu.memory_space<vmem>>, vector<1x1x16x1xf32>
    %41 = vector.shape_cast %40 : vector<1x1x16x1xf32> to vector<1x16x1xf32>
    %c3 = arith.constant 3 : index
    %c0_24 = arith.constant 0 : index
    %c0_25 = arith.constant 0 : index
    %c0_26 = arith.constant 0 : index
    %42 = vector.load %arg4[%c3, %c0_24, %c0_25, %c0_26] : memref<4x1x16x1xf32, #tpu.memory_space<vmem>>, vector<1x1x16x1xf32>
    %43 = vector.shape_cast %42 : vector<1x1x16x1xf32> to vector<1x16x1xf32>
    %cst_27 = arith.constant dense<0.000000e+00> : vector<16xf32>
    %44 = vector.multi_reduction <add>, %39, %cst_27 [0, 2] : vector<8x16x128xf32> to vector<16xf32>
    %45 = vector.shape_cast %44 : vector<16xf32> to vector<1x16x1xf32>
    %46 = arith.mulf %39, %39 : vector<8x16x128xf32>
    %cst_28 = arith.constant dense<0.000000e+00> : vector<16xf32>
    %47 = vector.multi_reduction <add>, %46, %cst_28 [0, 2] : vector<8x16x128xf32> to vector<16xf32>
    %48 = vector.shape_cast %47 : vector<16xf32> to vector<1x16x1xf32>
    %cst_29 = arith.constant 9.765625E-4 : f32
    %49 = vector.broadcast %cst_29 : f32 to vector<1x16x1xf32>
    %50 = arith.mulf %45, %49 : vector<1x16x1xf32>
    %cst_30 = arith.constant 9.765625E-4 : f32
    %51 = vector.broadcast %cst_30 : f32 to vector<1x16x1xf32>
    %52 = arith.mulf %48, %51 : vector<1x16x1xf32>
    %53 = arith.mulf %50, %50 : vector<1x16x1xf32>
    %54 = arith.subf %52, %53 : vector<1x16x1xf32>
    %cst_31 = arith.constant 0.000000e+00 : f32
    %55 = vector.broadcast %cst_31 : f32 to vector<1x16x1xf32>
    %56 = arith.maximumf %54, %55 : vector<1x16x1xf32>
    %cst_32 = arith.constant 9.99999974E-6 : f32
    %57 = vector.broadcast %cst_32 : f32 to vector<1x16x1xf32>
    %58 = arith.addf %56, %57 : vector<1x16x1xf32>
    %59 = math.rsqrt %58 : vector<1x16x1xf32>
    %60 = arith.mulf %41, %59 : vector<1x16x1xf32>
    %61 = arith.mulf %50, %60 : vector<1x16x1xf32>
    %62 = arith.subf %43, %61 : vector<1x16x1xf32>
    %63 = vector.broadcast %60 : vector<1x16x1xf32> to vector<8x16x128xf32>
    %64 = arith.mulf %39, %63 : vector<8x16x128xf32>
    %65 = vector.broadcast %62 : vector<1x16x1xf32> to vector<8x16x128xf32>
    %66 = arith.addf %64, %65 : vector<8x16x128xf32>
    %cst_33 = arith.constant 0.000000e+00 : f32
    %67 = vector.broadcast %cst_33 : f32 to vector<8x16x128xf32>
    %68 = arith.maximumf %66, %67 : vector<8x16x128xf32>
    %c0_34 = arith.constant 0 : index
    %c0_35 = arith.constant 0 : index
    %c0_36 = arith.constant 0 : index
    %69 = vector.load %arg1[%c0_34, %c0_35, %c0_36] : memref<8x16x128xf32, #tpu.memory_space<vmem>>, vector<8x16x128xf32>
    %70 = arith.addf %68, %69 : vector<8x16x128xf32>
    %cst_37 = arith.constant 0.000000e+00 : f32
    %71 = vector.broadcast %cst_37 : f32 to vector<8x16x128xf32>
    %72 = arith.maximumf %70, %71 : vector<8x16x128xf32>
    %c0_38 = arith.constant 0 : index
    %c0_39 = arith.constant 0 : index
    %c0_40 = arith.constant 0 : index
    %73 = vector.load %arg5[%c0_38, %c0_39, %c0_40] : memref<8x16x128xf32, #tpu.memory_space<vmem>>, vector<8x16x128xf32>
    tpu.vector_store %arg5[%c0_38, %c0_39, %c0_40], %72 {strides = array<i32>} : memref<8x16x128xf32, #tpu.memory_space<vmem>>, vector<8x16x128xf32>,
    return
  }
  func.func @transform_0(%arg0: i32) -> (i32, i32, i32) {
    %c0_i32 = arith.constant 0 : i32
    %c0_i32_0 = arith.constant 0 : i32
    %c0_i32_1 = arith.constant 0 : i32
    return %c0_i32, %arg0, %c0_i32_0 : i32, i32, i32
  }
  func.func @transform_1(%arg0: i32) -> (i32, i32) {
    %c0_i32 = arith.constant 0 : i32
    %c0_i32_0 = arith.constant 0 : i32
    %c0_i32_1 = arith.constant 0 : i32
    return %c0_i32, %c0_i32_0 : i32, i32
  }
  func.func @transform_2(%arg0: i32) -> (i32, i32) {
    %c0_i32 = arith.constant 0 : i32
    %c0_i32_0 = arith.constant 0 : i32
    %c0_i32_1 = arith.constant 0 : i32
    return %c0_i32, %c0_i32_0 : i32, i32
  }
  func.func @transform_3(%arg0: i32) -> (i32, i32, i32, i32) {
    %c0_i32 = arith.constant 0 : i32
    %c0_i32_0 = arith.constant 0 : i32
    %c0_i32_1 = arith.constant 0 : i32
    %c0_i32_2 = arith.constant 0 : i32
    return %c0_i32, %c0_i32_0, %arg0, %c0_i32_1 : i32, i32, i32, i32
  }
  func.func @transform_4(%arg0: i32) -> (i32, i32, i32) {
    %c0_i32 = arith.constant 0 : i32
    %c0_i32_0 = arith.constant 0 : i32
    %c0_i32_1 = arith.constant 0 : i32
    return %c0_i32, %arg0, %c0_i32_0 : i32, i32, i32
  }
}

</mosaic_0001>

<bundles_post_ra>
// kernel: tpu_custom_call.1
= control target key start
LH: loop header
LB: loop body
LE: loop exit
PB: predicated region body
PF: predicated region fallthrough
CT: control target
= control target key end

     0   :  { %9 = vsyncpa [#allocation3], 0  ;;  %s1355_s0 = inlined_call_operand.hbm [shape: f32[8,16,128], index: 0, kind: input, shape index: {}]   ;;  %s1356_s1 = inlined_call_operand.vmem [shape: bf16[128,128], index: 1, kind: input, shape index: {}]   ;;  %s1357_s2 = inlined_call_operand.hbm [shape: bf16[128,128], index: 2, kind: input, shape index: {}]   ;;  %s1358_s3 = inlined_call_operand.vmem [shape: f32[4,1,16,1], index: 3, kind: input, shape index: {}]   ;;  %s1359_s4 = inlined_call_operand.hbm [shape: f32[8,16,128], index: 4, kind: output, shape index: {}]  }
   0x1   :  { %10 = vsyncpa [#allocation6], 0 }
   0x2   :  { %11 = vsyncpa [#allocation4], 0  ;;  %s982_s15 = smov [#allocation2]   ;;  %s910_s19 = scalar_lea.hbm %s1355_s0, 2048 }
   0x3   :  { %s17_s16 = sshll.u32 %s982_s15, 4  ;;  %p911_p0 = scmp.ne.s32.totalorder %s1355_s0, %s910_s19  ;;  %s18_s16 = int_to_ptr.vmem [resolvable:$true] %s17_s16 }
   0x4   :  { %p914_p1 = scmp.lt.u32.totalorder %s910_s19, %s1355_s0 }
   0x6   :  { %p916_p2 = pnand %p914_p1, %p911_p0 }
   0x8   :  { %919 = shalt.err (!%p916_p2)
}
   0x9   :  { %s920_s24 = scalar_lea.vmem %s18_s16, 2048  ;;  %p925_p4 = scmp.lt.s32.totalorder %s18_s16, %s18_s16 }
   0xa   :  { %p921_p3 = scmp.ne.s32.totalorder %s18_s16, %s920_s24  ;;  %p926_p5 = scmp.lt.s32.totalorder %s920_s24, %s920_s24 }
   0xc   :  { %p927_p6 = por %p926_p5, %p925_p4 }
   0xe   :  { %p928_p7 = pnand %p927_p6, %p921_p3 }
  0x10   :  { %931 = shalt.err (!%p928_p7)
}
  0x11   :  { %s983_s25 = smov 128   ;;  %s984_s26 = smov 8  }
  0x12   :  { %23 = dma.hbm_to_vmem [thread:$0]  %s1355_s0, 2048, %s18_s16, [#allocation3], %s983_s25, %s983_s25, %s984_s26  }
  0x13   :  { %s985_s29 = smov [#allocation5]   ;;  %s932_s7 = scalar_lea.hbm %s1357_s2, 1024 }
  0x14   :  { %s31_s30 = sshll.u32 %s985_s29, 4  ;;  %p933_p8 = scmp.ne.s32.totalorder %s1357_s2, %s932_s7  ;;  %s32_s30 = int_to_ptr.vmem [resolvable:$true] %s31_s30 }
  0x15   :  { %p936_p9 = scmp.lt.u32.totalorder %s932_s7, %s1357_s2 }
  0x17   :  { %p938_p10 = pnand %p936_p9, %p933_p8 }
  0x19   :  { %941 = shalt.err (!%p938_p10)
}
  0x1a   :  { %s942_s12 = scalar_lea.vmem %s32_s30, 1024  ;;  %p947_p12 = scmp.lt.s32.totalorder %s32_s30, %s32_s30 }
  0x1b   :  { %p943_p11 = scmp.ne.s32.totalorder %s32_s30, %s942_s12  ;;  %p948_p13 = scmp.lt.s32.totalorder %s942_s12, %s942_s12 }
  0x1d   :  { %p949_p0 = por %p948_p13, %p947_p12 }
  0x1f   :  { %p950_p1 = pnand %p949_p0, %p943_p11 }
  0x21   :  { %953 = shalt.err (!%p950_p1)
}
  0x22   :  { %s986_s0 = smov 64   ;;  %s987_s13 = smov 4  }
  0x23   :  { %37 = dma.hbm_to_vmem [thread:$0]  %s1357_s2, 1024, %s32_s30, [#allocation6], %s986_s0, %s986_s0, %s987_s13  }
  0x24   :  { %976 = dma.done.wait [#allocation3], 2048  }
  0x25   :  { %977 = vsyncadd [#allocation3], 4294965248 }
  0x26   :  { %978 = dma.done.wait [#allocation6], 1024  }
  0x27   :  { %979 = vsyncadd [#allocation6], 4294966272  ;;  %v886_v0 = vld [vmem:[%s1356_s1] sm:$0xff]   ;;  %v887_v1 = vld [vmem:[%s1356_s1 + $0x8] sm:$0xff]  }
  0x28   :  { %812 = vmatprep.subr.bf16.mxu0 %v886_v0  ;;  %v888_v2 = vld [vmem:[%s1356_s1 + $0x10] sm:$0xff]   ;;  %v889_v3 = vld [vmem:[%s1356_s1 + $0x18] sm:$0xff]   ;;  %v1054_v4 = vld [vmem:[#allocation2] sm:$0xff] }
  0x29   :  { %813 = vmatpush3.bf16.msra.mxu0 %v886_v0  ;;  %v1056_v5 = vld [vmem:[#allocation2 + $0x8] sm:$0xff]  ;;  %v890_v7 = vld [vmem:[%s1356_s1 + $0x20] sm:$0xff]   ;;  %v892_v9 = vld [vmem:[%s1356_s1 + $0x30] sm:$0xff]  }
  0x2a   :  { %814 = vmatprep.subr.bf16.mxu0 %v887_v1  ;;  %v63_v6 = vpack.c.bf16 %v1056_v5, %v1054_v4  ;;  %v891_v8 = vld [vmem:[%s1356_s1 + $0x28] sm:$0xff]   ;;  %v893_v10 = vld [vmem:[%s1356_s1 + $0x38] sm:$0xff]   ;;  %v1072_v11 = vld [vmem:[#allocation2 + $0x10] sm:$0xff] }
  0x2b   :  { %v1074_v12 = vld [vmem:[#allocation2 + $0x18] sm:$0xff]  ;;  %v1076_v13 = vld [vmem:[#allocation2 + $0x20] sm:$0xff]  ;;  %v1078_v14 = vld [vmem:[#allocation2 + $0x28] sm:$0xff] }
  0x2c   :  { %828 = vmatprep.mubr.bf16.mxu0 %v63_v6  ;;  %v64_v15 = vpack.c.bf16 %v1074_v12, %v1072_v11  ;;  %v65_v16 = vpack.c.bf16 %v1078_v14, %v1076_v13  ;;  %v1084_v17 = vld [vmem:[#allocation2 + $0x30] sm:$0xff]  ;;  %v1086_v18 = vld [vmem:[#allocation2 + $0x38] sm:$0xff]  ;;  %v1088_v19 = vld [vmem:[#allocation2 + $0x40] sm:$0xff] }
  0x2d   :  { %815 = vmatpush3.bf16.msra.mxu0 %v887_v1  ;;  %v1090_v20 = vld [vmem:[#allocation2 + $0x48] sm:$0xff]  ;;  %v66_v21 = vpack.c.bf16 %v1086_v18, %v1084_v17  ;;  %v1096_v23 = vld [vmem:[#allocation2 + $0x50] sm:$0xff]  ;;  %v1098_v24 = vld [vmem:[#allocation2 + $0x58] sm:$0xff] }
  0x2e   :  { %816 = vmatprep.subr.bf16.mxu0 %v888_v2  ;;  %v67_v22 = vpack.c.bf16 %v1090_v20, %v1088_v19  ;;  %v1100_v25 = vld [vmem:[#allocation2 + $0x60] sm:$0xff]  ;;  %v1102_v26 = vld [vmem:[#allocation2 + $0x68] sm:$0xff]  ;;  %v68_v27 = vpack.c.bf16 %v1098_v24, %v1096_v23  ;;  %v1108_v29 = vld [vmem:[#allocation2 + $0x70] sm:$0xff] }
  0x2f   :  { %v69_v28 = vpack.c.bf16 %v1102_v26, %v1100_v25  ;;  %v1110_v30 = vld [vmem:[#allocation2 + $0x78] sm:$0xff] }
  0x30   :  { %v70_v31 = vpack.c.bf16 %v1110_v30, %v1108_v29 }
  0x31   :  { %817 = vmatpush3.bf16.msra.mxu0 %v888_v2 }
  0x32   :  { %818 = vmatprep.subr.bf16.mxu0 %v889_v3 }
  0x35   :  { %819 = vmatpush3.bf16.msra.mxu0 %v889_v3 }
  0x36   :  { %820 = vmatprep.subr.bf16.mxu0 %v890_v7 }
  0x39   :  { %821 = vmatpush3.bf16.msra.mxu0 %v890_v7 }
  0x3a   :  { %822 = vmatprep.subr.bf16.mxu0 %v891_v8 }
  0x3d   :  { %823 = vmatpush3.bf16.msra.mxu0 %v891_v8 }
  0x3e   :  { %824 = vmatprep.subr.bf16.mxu0 %v892_v9 }
  0x41   :  { %825 = vmatpush3.bf16.msra.mxu0 %v892_v9 }
  0x42   :  { %826 = vmatprep.subr.bf16.mxu0 %v893_v10 }
  0x45   :  { %827 = vmatpush3.bf16.msra.mxu0 %v893_v10 }
  0x48   :  { %829 = vmatmul.mubr.bf16.vlgmr.msra.gmra.mrb[0].mxu0 %v64_v15 }
  0x49   :  { %832 = vmatprep.mubr.bf16.mxu0 %v65_v16 }
  0x50   :  { %833 = vmatmul.mubr.bf16.gmra.mrb[4].mxu0 %v66_v21 }
  0x51   :  { %836 = vmatprep.mubr.bf16.mxu0 %v67_v22 }
  0x58   :  { %837 = vmatmul.mubr.bf16.gmra.mrb[8].mxu0 %v68_v27 }
  0x59   :  { %840 = vmatprep.mubr.bf16.mxu0 %v69_v28 }
  0x60   :  { %841 = vmatmul.mubr.bf16.gmra.mrb[12].mxu0 %v70_v31 }
 0x11b   :  { %v1114_v32 = vpop.f32.mrb[0].mxu0 }
 0x11c   :  { %v257_v33 = vmul.f32 %v1114_v32, %v1114_v32  ;;  %v1118_v34 = vpop.f32.mrb[1].mxu0 }
 0x11d   :  { %v237_v35 = vadd.f32 %v1114_v32, %v1118_v34  ;;  %v255_v36 = vmul.f32 %v1118_v34, %v1118_v34  ;;  %v1124_v37 = vpop.f32.mrb[2].mxu0 }
 0x11e   :  { %v258_v38 = vmul.f32 %v1124_v37, %v1124_v37  ;;  %v1128_v39 = vpop.f32.mrb[3].mxu0 }
 0x11f   :  { %v271_v40 = vadd.f32 %v257_v33, %v255_v36  ;;  %v246_v41 = vadd.f32 %v1124_v37, %v1128_v39  ;;  %v256_v42 = vmul.f32 %v1128_v39, %v1128_v39 }
 0x121   :  { %v280_v43 = vadd.f32 %v258_v38, %v256_v42 }
 0x123   :  { %v1134_v44 = vpop.f32.mrb[4].mxu0 }
 0x124   :  { %v1136_v45 = vpop.f32.mrb[5].mxu0  ;;  %v261_v49 = vmul.f32 %v1134_v44, %v1134_v44 }
 0x125   :  { %v238_v46 = vadd.f32 %v237_v35, %v1136_v45  ;;  %v259_v47 = vmul.f32 %v1136_v45, %v1136_v45  ;;  %v1141_v48 = vpop.f32.mrb[6].mxu0 }
 0x126   :  { %v1145_v50 = vpop.f32.mrb[7].mxu0  ;;  %v262_v55 = vmul.f32 %v1141_v48, %v1141_v48 }
 0x127   :  { %v272_v51 = vadd.f32 %v271_v40, %v259_v47  ;;  %v247_v52 = vadd.f32 %v246_v41, %v1145_v50  ;;  %v260_v53 = vmul.f32 %v1145_v50, %v1145_v50  ;;  %v239_v54 = vadd.f32 %v1134_v44, %v238_v46 }
 0x129   :  { %v281_v56 = vadd.f32 %v280_v43, %v260_v53  ;;  %v273_v57 = vadd.f32 %v272_v51, %v261_v49  ;;  %v248_v58 = vadd.f32 %v1141_v48, %v247_v52  ;;  %v988_v52 = vmov 0   ;;  %v894_v53 = vld [vmem:[#allocation5] sm:$0xff]  }
 0x12a   :  { %884 = vset.pattern.permute.xlu0 %v988_v52  ;;  %885 = vset.pattern.permute.xlu1 %v988_v52 }
 0x12b   :  { %v1154_v59 = vpop.f32.mrb[8].mxu0  ;;  %v282_v60 = vadd.f32 %v281_v56, %v262_v55  ;;  %844 = vmatprep.subr.bf16.mxu1 %v894_v53  ;;  %v896_v55 = vld [vmem:[#allocation5 + $0x10] sm:$0xff]   ;;  %v897_v56 = vld [vmem:[#allocation5 + $0x18] sm:$0xff]  }
 0x12c   :  { %v1156_v61 = vpop.f32.mrb[9].mxu0  ;;  %v265_v1 = vmul.f32 %v1154_v59, %v1154_v59  ;;  %845 = vmatpush3.bf16.msra.mxu1 %v894_v53  ;;  %v767_v53 = vld [vmem:[%s1358_s3 + $0x18] sm:$0xff] }
 0x12d   :  { %v240_v62 = vadd.f32 %v239_v54, %v1156_v61  ;;  %v263_v63 = vmul.f32 %v1156_v61, %v1156_v61  ;;  %v1161_v0 = vpop.f32.mrb[10].mxu0  ;;  %v895_v54 = vld [vmem:[#allocation5 + $0x8] sm:$0xff]  }
 0x12e   :  { %v1165_v2 = vpop.f32.mrb[11].mxu0  ;;  %v266_v9 = vmul.f32 %v1161_v0, %v1161_v0  ;;  %846 = vmatprep.subr.bf16.mxu1 %v895_v54 }
 0x12f   :  { %v274_v3 = vadd.f32 %v273_v57, %v263_v63  ;;  %v249_v6 = vadd.f32 %v248_v58, %v1165_v2  ;;  %v264_v7 = vmul.f32 %v1165_v2, %v1165_v2  ;;  %v241_v8 = vadd.f32 %v1154_v59, %v240_v62 }
 0x130   :  { %847 = vmatpush3.bf16.msra.mxu1 %v895_v54  ;;  %v900_v54 = vld [vmem:[#allocation5 + $0x30] sm:$0xff]  }
 0x131   :  { %v283_v10 = vadd.f32 %v282_v60, %v264_v7  ;;  %v250_v15 = vadd.f32 %v1161_v0, %v249_v6  ;;  %v275_v16 = vadd.f32 %v274_v3, %v265_v1  ;;  %848 = vmatprep.subr.bf16.mxu1 %v896_v55 }
 0x133   :  { %v1174_v21 = vpop.f32.mrb[12].mxu0  ;;  %v284_v22 = vadd.f32 %v283_v10, %v266_v9 }
 0x134   :  { %v1176_v27 = vpop.f32.mrb[13].mxu0  ;;  %v269_v36 = vmul.f32 %v1174_v21, %v1174_v21  ;;  %849 = vmatpush3.bf16.msra.mxu1 %v896_v55 }
 0x135   :  { %v267_v28 = vmul.f32 %v1176_v27, %v1176_v27  ;;  %v1180_v31 = vpop.f32.mrb[14].mxu0  ;;  %v242_v33 = vadd.f32 %v241_v8, %v1176_v27  ;;  %850 = vmatprep.subr.bf16.mxu1 %v897_v56 }
 0x136   :  { %v1183_v35 = vpop.f32.mrb[15].mxu0  ;;  %v270_v47 = vmul.f32 %v1180_v31, %v1180_v31 }
 0x137   :  { %v251_v38 = vadd.f32 %v250_v15, %v1183_v35  ;;  %v268_v40 = vmul.f32 %v1183_v35, %v1183_v35  ;;  %v243_v41 = vadd.f32 %v1174_v21, %v242_v33  ;;  %v276_v42 = vadd.f32 %v275_v16, %v267_v28  ;;  %v232_v33 = vld [vmem:[%s1358_s3] sm:$0xff] }
 0x138   :  { %851 = vmatpush3.bf16.msra.mxu1 %v897_v56  ;;  %v901_v56 = vld [vmem:[#allocation5 + $0x38] sm:$0xff]  }
 0x139   :  { %244 = vadd.xlane.f32.xlu0 %v243_v41  ;;  %v277_v43 = vadd.f32 %v276_v42, %v269_v36  ;;  %v252_v46 = vadd.f32 %v1180_v31, %v251_v38  ;;  %v285_v49 = vadd.f32 %v284_v22, %v268_v40  ;;  %v233_v40 = vld [vmem:[%s1358_s3 + $0x8] sm:$0xff]  ;;  %v898_v41 = vld [vmem:[#allocation5 + $0x20] sm:$0xff]  }
 0x13a   :  { %852 = vmatprep.subr.bf16.mxu1 %v898_v41 }
 0x13b   :  { %278 = vadd.xlane.f32.xlu1 %v277_v43  ;;  %v286_v51 = vadd.f32 %v285_v49, %v270_v47  ;;  %v766_v47 = vld [vmem:[%s1358_s3 + $0x10] sm:$0xff]  ;;  %v899_v49 = vld [vmem:[#allocation5 + $0x28] sm:$0xff]  }
 0x13c   :  { %853 = vmatpush3.bf16.msra.mxu1 %v898_v41 }
 0x13d   :  { %253 = vadd.xlane.f32.xlu0 %v252_v46  ;;  %854 = vmatprep.subr.bf16.mxu1 %v899_v49 }
 0x13f   :  { %287 = vadd.xlane.f32.xlu1 %v286_v51 }
 0x140   :  { %855 = vmatpush3.bf16.msra.mxu1 %v899_v49 }
 0x141   :  { %856 = vmatprep.subr.bf16.mxu1 %v900_v54 }
 0x144   :  { %857 = vmatpush3.bf16.msra.mxu1 %v900_v54 }
 0x145   :  { %858 = vmatprep.subr.bf16.mxu1 %v901_v56 }
 0x148   :  { %859 = vmatpush3.bf16.msra.mxu1 %v901_v56 }
 0x1c6   :  { %v245_v57 = vpop.xlane.xlu0 %244 }
 0x1c7   :  { %v289_v58 = vmul.f32 0.0009765625, %v245_v57 }
 0x1c8   :  { %v279_v60 = vpop.xlane.xlu1 %278 }
 0x1c9   :  { %v293_v62 = vmul.f32 %v289_v58, %v289_v58  ;;  %v291_v63 = vmul.f32 0.0009765625, %v279_v60 }
 0x1ca   :  { %v254_v1 = vpop.xlane.xlu0 %253 }
 0x1cb   :  { %v295_v3 = vsub.f32 %v291_v63, %v293_v62  ;;  %v290_v6 = vmul.f32 0.0009765625, %v254_v1 }
 0x1cc   :  { %v288_v7 = vpop.xlane.xlu1 %287 }
 0x1cd   :  { %v297_v8 = vmax.f32 %v295_v3, 0.0  ;;  %v294_v9 = vmul.f32 %v290_v6, %v290_v6  ;;  %v292_v10 = vmul.f32 0.0009765625, %v288_v7 }
 0x1cf   :  { %v299_v15 = vadd.f32 1e-05, %v297_v8  ;;  %v296_v16 = vsub.f32 %v292_v10, %v294_v9 }
 0x1d1   :  { %902 = vrsqrt.f32 %v299_v15  ;;  %v298_v22 = vmax.f32 %v296_v16, 0.0 }
 0x1d3   :  { %v300_v28 = vadd.f32 1e-05, %v298_v22 }
 0x1d5   :  { %904 = vrsqrt.f32 %v300_v28 }
 0x1db   :  { %v903_v36 = vpop.eup %902 }
 0x1dc   :  { %v303_v38 = vmul.f32 %v903_v36, %v232_v33 }
 0x1de   :  { %311 = vperm.xlu0 %884, %v303_v38   ;;  %v305_v46 = vmul.f32 %v303_v38, %v289_v58 }
 0x1df   :  { %v905_v42 = vpop.eup %904 }
 0x1e0   :  { %v304_v43 = vmul.f32 %v905_v42, %v233_v40  ;;  %v307_v51 = vsub.f32 %v766_v47, %v305_v46 }
 0x1e2   :  { %316 = vperm.xlu1 %885, %v304_v43   ;;  %v306_v52 = vmul.f32 %v304_v43, %v290_v6 }
 0x1e4   :  { %v308_v55 = vsub.f32 %v767_v53, %v306_v52 }
 0x1e6   :  { %337 = vperm.xlu1 %885, %v307_v51  }
 0x1ea   :  { %342 = vperm.xlu1 %885, %v308_v55  }
 0x25d   :  { %v312_v57 = vpop.permute.xlu0 %311 }
 0x25e   :  { %v319_v60 = vmul.f32 %v312_v57, %v1118_v34  ;;  %v321_v62 = vmul.f32 %v1114_v32, %v312_v57  ;;  %v323_v63 = vmul.f32 %v312_v57, %v1136_v45  ;;  %v325_v1 = vmul.f32 %v1134_v44, %v312_v57 }
 0x25f   :  { %v327_v3 = vmul.f32 %v312_v57, %v1156_v61  ;;  %v329_v6 = vmul.f32 %v1154_v59, %v312_v57  ;;  %v331_v7 = vmul.f32 %v312_v57, %v1176_v27  ;;  %v333_v8 = vmul.f32 %v1174_v21, %v312_v57 }
 0x261   :  { %v317_v58 = vpop.permute.xlu1 %316 }
 0x262   :  { %v320_v9 = vmul.f32 %v317_v58, %v1128_v39  ;;  %v322_v10 = vmul.f32 %v1124_v37, %v317_v58  ;;  %v324_v34 = vmul.f32 %v317_v58, %v1145_v50  ;;  %v326_v32 = vmul.f32 %v1141_v48, %v317_v58 }
 0x263   :  { %v328_v45 = vmul.f32 %v317_v58, %v1165_v2  ;;  %v330_v44 = vmul.f32 %v1161_v0, %v317_v58  ;;  %v332_v61 = vmul.f32 %v317_v58, %v1183_v35  ;;  %v334_v59 = vmul.f32 %v1180_v31, %v317_v58 }
 0x265   :  { %v338_v15 = vpop.permute.xlu1 %337 }
 0x266   :  { %v345_v27 = vadd.f32 %v338_v15, %v319_v60  ;;  %v347_v16 = vadd.f32 %v338_v15, %v321_v62  ;;  %v349_v21 = vadd.f32 %v338_v15, %v323_v63  ;;  %v351_v22 = vadd.f32 %v338_v15, %v325_v1 }
 0x267   :  { %v353_v39 = vadd.f32 %v338_v15, %v327_v3  ;;  %v355_v28 = vadd.f32 %v338_v15, %v329_v6  ;;  %v357_v37 = vadd.f32 %v338_v15, %v331_v7  ;;  %v359_v33 = vadd.f32 %v338_v15, %v333_v8 }
 0x268   :  { %v361_v50 = vmax.f32 %v345_v27, 0.0  ;;  %v363_v36 = vmax.f32 %v347_v16, 0.0  ;;  %v365_v48 = vmax.f32 %v349_v21, 0.0  ;;  %v367_v38 = vmax.f32 %v351_v22, 0.0 }
 0x269   :  { %v343_v40 = vpop.permute.xlu1 %342  ;;  %v369_v2 = vmax.f32 %v353_v39, 0.0  ;;  %v371_v41 = vmax.f32 %v355_v28, 0.0  ;;  %v373_v0 = vmax.f32 %v357_v37, 0.0  ;;  %v375_v42 = vmax.f32 %v359_v33, 0.0 }
 0x26a   :  { %v346_v35 = vadd.f32 %v343_v40, %v320_v9  ;;  %v348_v43 = vadd.f32 %v343_v40, %v322_v10  ;;  %v350_v31 = vadd.f32 %v343_v40, %v324_v34  ;;  %v352_v46 = vadd.f32 %v343_v40, %v326_v32 }
 0x26b   :  { %v354_v47 = vadd.f32 %v343_v40, %v328_v45  ;;  %v356_v49 = vadd.f32 %v343_v40, %v330_v44  ;;  %v358_v51 = vadd.f32 %v343_v40, %v332_v61  ;;  %v360_v52 = vadd.f32 %v343_v40, %v334_v59 }
 0x26c   :  { %v362_v53 = vmax.f32 %v346_v35, 0.0  ;;  %v364_v54 = vmax.f32 %v348_v43, 0.0  ;;  %v366_v55 = vmax.f32 %v350_v31, 0.0  ;;  %v368_v56 = vmax.f32 %v352_v46, 0.0 }
 0x26d   :  { %v370_v57 = vmax.f32 %v354_v47, 0.0  ;;  %v372_v58 = vmax.f32 %v356_v49, 0.0  ;;  %v374_v60 = vmax.f32 %v358_v51, 0.0  ;;  %v376_v62 = vmax.f32 %v360_v52, 0.0 }
 0x26e   :  { %v377_v63 = vpack.c.bf16 %v362_v53, %v361_v50  ;;  %v378_v1 = vpack.c.bf16 %v364_v54, %v363_v36  ;;  %v379_v3 = vpack.c.bf16 %v366_v55, %v365_v48  ;;  %v380_v6 = vpack.c.bf16 %v368_v56, %v367_v38 }
 0x26f   :  { %v381_v7 = vpack.c.bf16 %v370_v57, %v369_v2  ;;  %v382_v8 = vpack.c.bf16 %v372_v58, %v371_v41  ;;  %v383_v9 = vpack.c.bf16 %v374_v60, %v373_v0  ;;  %v384_v10 = vpack.c.bf16 %v376_v62, %v375_v42 }
 0x270   :  { %860 = vmatprep.mubr.bf16.mxu1 %v377_v63 }
 0x271   :  { %861 = vmatmul.mubr.bf16.vlgmr.msra.gmra.mrb[0].mxu1 %v378_v1 }
 0x272   :  { %864 = vmatprep.mubr.bf16.mxu1 %v379_v3 }
 0x279   :  { %865 = vmatmul.mubr.bf16.gmra.mrb[4].mxu1 %v380_v6 }
 0x27a   :  { %868 = vmatprep.mubr.bf16.mxu1 %v381_v7 }
 0x281   :  { %869 = vmatmul.mubr.bf16.gmra.mrb[8].mxu1 %v382_v8 }
 0x282   :  { %872 = vmatprep.mubr.bf16.mxu1 %v383_v9 }
 0x289   :  { %873 = vmatmul.mubr.bf16.gmra.mrb[12].mxu1 %v384_v10 }
 0x344   :  { %v1222_v34 = vpop.f32.mrb[0].mxu1 }
 0x345   :  { %v572_v32 = vmul.f32 %v1222_v34, %v1222_v34  ;;  %v1226_v15 = vpop.f32.mrb[1].mxu1 }
 0x346   :  { %v552_v45 = vadd.f32 %v1222_v34, %v1226_v15  ;;  %v570_v44 = vmul.f32 %v1226_v15, %v1226_v15  ;;  %v1232_v61 = vpop.f32.mrb[2].mxu1 }
 0x347   :  { %v573_v59 = vmul.f32 %v1232_v61, %v1232_v61  ;;  %v1236_v27 = vpop.f32.mrb[3].mxu1 }
 0x348   :  { %v586_v16 = vadd.f32 %v572_v32, %v570_v44  ;;  %v561_v21 = vadd.f32 %v1232_v61, %v1236_v27  ;;  %v571_v22 = vmul.f32 %v1236_v27, %v1236_v27 }
 0x34a   :  { %v595_v39 = vadd.f32 %v573_v59, %v571_v22 }
 0x34c   :  { %v1242_v28 = vpop.f32.mrb[4].mxu1 }
 0x34d   :  { %v1244_v37 = vpop.f32.mrb[5].mxu1  ;;  %v576_v48 = vmul.f32 %v1242_v28, %v1242_v28 }
 0x34e   :  { %v553_v33 = vadd.f32 %v552_v45, %v1244_v37  ;;  %v574_v50 = vmul.f32 %v1244_v37, %v1244_v37  ;;  %v1249_v36 = vpop.f32.mrb[6].mxu1 }
 0x34f   :  { %v1253_v38 = vpop.f32.mrb[7].mxu1  ;;  %v577_v42 = vmul.f32 %v1249_v36, %v1249_v36 }
 0x350   :  { %v587_v40 = vadd.f32 %v586_v16, %v574_v50  ;;  %v562_v2 = vadd.f32 %v561_v21, %v1253_v38  ;;  %v575_v41 = vmul.f32 %v1253_v38, %v1253_v38  ;;  %v554_v0 = vadd.f32 %v1242_v28, %v553_v33 }
 0x352   :  { %v596_v35 = vadd.f32 %v595_v39, %v575_v41  ;;  %v588_v43 = vadd.f32 %v587_v40, %v576_v48  ;;  %v563_v31 = vadd.f32 %v1249_v36, %v562_v2 }
 0x354   :  { %v1262_v46 = vpop.f32.mrb[8].mxu1  ;;  %v597_v47 = vadd.f32 %v596_v35, %v577_v42 }
 0x355   :  { %v1264_v49 = vpop.f32.mrb[9].mxu1  ;;  %v580_v54 = vmul.f32 %v1262_v46, %v1262_v46 }
 0x356   :  { %v555_v51 = vadd.f32 %v554_v0, %v1264_v49  ;;  %v578_v52 = vmul.f32 %v1264_v49, %v1264_v49  ;;  %v1269_v53 = vpop.f32.mrb[10].mxu1 }
 0x357   :  { %v1273_v55 = vpop.f32.mrb[11].mxu1  ;;  %v581_v62 = vmul.f32 %v1269_v53, %v1269_v53 }
 0x358   :  { %v589_v56 = vadd.f32 %v588_v43, %v578_v52  ;;  %v564_v57 = vadd.f32 %v563_v31, %v1273_v55  ;;  %v579_v58 = vmul.f32 %v1273_v55, %v1273_v55  ;;  %v556_v60 = vadd.f32 %v1262_v46, %v555_v51 }
 0x35a   :  { %v598_v63 = vadd.f32 %v597_v47, %v579_v58  ;;  %v565_v1 = vadd.f32 %v1269_v53, %v564_v57  ;;  %v590_v3 = vadd.f32 %v589_v56, %v580_v54 }
 0x35c   :  { %v1282_v6 = vpop.f32.mrb[12].mxu1  ;;  %v599_v7 = vadd.f32 %v598_v63, %v581_v62  ;;  %v776_v63 = vld [vmem:[%s1358_s3 + $0x20] sm:$0xff] }
 0x35d   :  { %v531_v8 = vpop.f32.mrb[13].mxu1  ;;  %v584_v44 = vmul.f32 %v1282_v6, %v1282_v6 }
 0x35e   :  { %v582_v9 = vmul.f32 %v531_v8, %v531_v8  ;;  %v1284_v10 = vpop.f32.mrb[14].mxu1  ;;  %v557_v32 = vadd.f32 %v556_v60, %v531_v8 }
 0x35f   :  { %v1286_v45 = vpop.f32.mrb[15].mxu1  ;;  %v585_v50 = vmul.f32 %v1284_v10, %v1284_v10 }
 0x360   :  { %v566_v59 = vadd.f32 %v565_v1, %v1286_v45  ;;  %v583_v16 = vmul.f32 %v1286_v45, %v1286_v45  ;;  %v558_v21 = vadd.f32 %v1282_v6, %v557_v32  ;;  %v591_v22 = vadd.f32 %v590_v3, %v582_v9  ;;  %v777_v9 = vld [vmem:[%s1358_s3 + $0x28] sm:$0xff] }
 0x362   :  { %559 = vadd.xlane.f32.xlu1 %v558_v21  ;;  %v567_v39 = vadd.f32 %v1284_v10, %v566_v59  ;;  %v592_v33 = vadd.f32 %v591_v22, %v584_v44  ;;  %v600_v48 = vadd.f32 %v599_v7, %v583_v16  ;;  %v778_v7 = vld [vmem:[%s1358_s3 + $0x30] sm:$0xff]  ;;  %v779_v21 = vld [vmem:[%s1358_s3 + $0x38] sm:$0xff]  ;;  %s989_s3 = smov [#allocation7]  }
 0x363   :  { %s745_s21 = sshll.u32 %s989_s3, 4  ;;  %s746_s21 = int_to_ptr.vmem [resolvable:$true] %s745_s21 }
 0x364   :  { %568 = vadd.xlane.f32.xlu0 %v567_v39  ;;  %v601_v40 = vadd.f32 %v600_v48, %v585_v50  ;;  %s954_s2 = scalar_lea.vmem %s746_s21, 2048  ;;  %p959_p3 = scmp.lt.s32.totalorder %s746_s21, %s746_s21 }
 0x365   :  { %p955_p2 = scmp.ne.s32.totalorder %s746_s21, %s954_s2  ;;  %p960_p4 = scmp.lt.s32.totalorder %s954_s2, %s954_s2 }
 0x366   :  { %593 = vadd.xlane.f32.xlu1 %v592_v33 }
 0x367   :  { %p961_p5 = por %p960_p4, %p959_p3 }
 0x369   :  { %p962_p6 = pnand %p961_p5, %p955_p2 }
 0x36a   :  { %602 = vadd.xlane.f32.xlu1 %v601_v40 }
 0x3ef   :  { %v560_v2 = vpop.xlane.xlu1 %559 }
 0x3f0   :  { %v604_v41 = vmul.f32 0.0009765625, %v560_v2 }
 0x3f1   :  { %v569_v0 = vpop.xlane.xlu0 %568 }
 0x3f2   :  { %v608_v35 = vmul.f32 %v604_v41, %v604_v41  ;;  %v605_v43 = vmul.f32 0.0009765625, %v569_v0 }
 0x3f3   :  { %v594_v42 = vpop.xlane.xlu1 %593 }
 0x3f4   :  { %v606_v31 = vmul.f32 0.0009765625, %v594_v42  ;;  %v609_v52 = vmul.f32 %v605_v43, %v605_v43 }
 0x3f6   :  { %v610_v47 = vsub.f32 %v606_v31, %v608_v35 }
 0x3f7   :  { %v603_v51 = vpop.xlane.xlu1 %602 }
 0x3f8   :  { %v612_v54 = vmax.f32 %v610_v47, 0.0  ;;  %v607_v56 = vmul.f32 0.0009765625, %v603_v51 }
 0x3fa   :  { %v614_v57 = vadd.f32 1e-05, %v612_v54  ;;  %v611_v58 = vsub.f32 %v607_v56, %v609_v52 }
 0x3fc   :  { %906 = vrsqrt.f32 %v614_v57  ;;  %v613_v60 = vmax.f32 %v611_v58, 0.0 }
 0x3fe   :  { %v615_v62 = vadd.f32 1e-05, %v613_v60 }
 0x400   :  { %908 = vrsqrt.f32 %v615_v62 }
 0x406   :  { %v907_v1 = vpop.eup %906 }
 0x407   :  { %v618_v3 = vmul.f32 %v907_v1, %v776_v63 }
 0x409   :  { %626 = vperm.xlu1 %885, %v618_v3   ;;  %v620_v32 = vmul.f32 %v618_v3, %v604_v41 }
 0x40a   :  { %v909_v44 = vpop.eup %908 }
 0x40b   :  { %v622_v59 = vsub.f32 %v778_v7, %v620_v32  ;;  %v619_v16 = vmul.f32 %v909_v44, %v777_v9 }
 0x40d   :  { %652 = vperm.xlu1 %885, %v622_v59   ;;  %631 = vperm.xlu0 %884, %v619_v16   ;;  %v621_v22 = vmul.f32 %v619_v16, %v605_v43 }
 0x40f   :  { %v623_v39 = vsub.f32 %v779_v21, %v621_v22 }
 0x411   :  { %657 = vperm.xlu1 %885, %v623_v39  }
 0x488   :  { %v627_v33 = vpop.permute.xlu1 %626 }
 0x489   :  { %v634_v50 = vmul.f32 %v627_v33, %v1226_v15  ;;  %v636_v48 = vmul.f32 %v1222_v34, %v627_v33  ;;  %v638_v40 = vmul.f32 %v627_v33, %v1244_v37  ;;  %v640_v2 = vmul.f32 %v1242_v28, %v627_v33 }
 0x48a   :  { %v642_v41 = vmul.f32 %v627_v33, %v1264_v49  ;;  %v644_v0 = vmul.f32 %v1262_v46, %v627_v33  ;;  %v646_v42 = vmul.f32 %v627_v33, %v531_v8  ;;  %v648_v35 = vmul.f32 %v1282_v6, %v627_v33 }
 0x48c   :  { %v653_v31 = vpop.permute.xlu1 %652  ;;  %v632_v44 = vpop.permute.xlu0 %631 }
 0x48d   :  { %v660_v43 = vadd.f32 %v653_v31, %v634_v50  ;;  %v662_v47 = vadd.f32 %v653_v31, %v636_v48  ;;  %v664_v51 = vadd.f32 %v653_v31, %v638_v40  ;;  %v666_v52 = vadd.f32 %v653_v31, %v640_v2 }
 0x48e   :  { %v668_v54 = vadd.f32 %v653_v31, %v642_v41  ;;  %v670_v15 = vadd.f32 %v653_v31, %v644_v0  ;;  %v672_v56 = vadd.f32 %v653_v31, %v646_v42  ;;  %v674_v34 = vadd.f32 %v653_v31, %v648_v35 }
 0x48f   :  { %v676_v57 = vmax.f32 %v660_v43, 0.0  ;;  %v678_v37 = vmax.f32 %v662_v47, 0.0  ;;  %v680_v58 = vmax.f32 %v664_v51, 0.0  ;;  %v682_v28 = vmax.f32 %v666_v52, 0.0 }
 0x490   :  { %v684_v60 = vmax.f32 %v668_v54, 0.0  ;;  %v686_v49 = vmax.f32 %v670_v15, 0.0  ;;  %v688_v62 = vmax.f32 %v672_v56, 0.0  ;;  %v690_v46 = vmax.f32 %v674_v34, 0.0 }
 0x491   :  { %v692_v8 = vadd.f32 %v676_v57, %v1054_v4  ;;  %v694_v6 = vadd.f32 %v678_v37, %v1072_v11  ;;  %v696_v63 = vadd.f32 %v680_v58, %v1076_v13  ;;  %v698_v1 = vadd.f32 %v682_v28, %v1084_v17  ;;  %v658_v13 = vpop.permute.xlu1 %657 }
 0x492   :  { %v700_v3 = vadd.f32 %v684_v60, %v1088_v19  ;;  %v702_v7 = vadd.f32 %v686_v49, %v1096_v23  ;;  %v704_v9 = vadd.f32 %v688_v62, %v1100_v25  ;;  %v706_v32 = vadd.f32 %v690_v46, %v1108_v29 }
 0x493   :  { %v708_v59 = vmax.f32 %v692_v8, 0.0  ;;  %v710_v16 = vmax.f32 %v694_v6, 0.0  ;;  %v712_v21 = vmax.f32 %v696_v63, 0.0  ;;  %v714_v22 = vmax.f32 %v698_v1, 0.0 }
 0x494   :  { %v716_v4 = vmax.f32 %v700_v3, 0.0  ;;  %v718_v39 = vmax.f32 %v702_v7, 0.0  ;;  %v720_v11 = vmax.f32 %v704_v9, 0.0  ;;  %v722_v33 = vmax.f32 %v706_v32, 0.0 }
 0x495   :  { %724 = vst [vmem:[#allocation7] sm:$0xff] %v708_v59  ;;  %726 = vst [vmem:[#allocation7 + $0x10] sm:$0xff] %v710_v16  ;;  %v635_v17 = vmul.f32 %v632_v44, %v1236_v27  ;;  %v637_v19 = vmul.f32 %v1232_v61, %v632_v44  ;;  %v639_v23 = vmul.f32 %v632_v44, %v1253_v38 }
 0x496   :  { %728 = vst [vmem:[#allocation7 + $0x20] sm:$0xff] %v712_v21  ;;  %730 = vst [vmem:[#allocation7 + $0x30] sm:$0xff] %v714_v22  ;;  %v641_v25 = vmul.f32 %v1249_v36, %v632_v44  ;;  %v643_v29 = vmul.f32 %v632_v44, %v1273_v55  ;;  %v645_v50 = vmul.f32 %v1269_v53, %v632_v44 }
 0x497   :  { %732 = vst [vmem:[#allocation7 + $0x40] sm:$0xff] %v716_v4  ;;  %734 = vst [vmem:[#allocation7 + $0x50] sm:$0xff] %v718_v39  ;;  %v647_v48 = vmul.f32 %v632_v44, %v1286_v45  ;;  %v649_v40 = vmul.f32 %v1284_v10, %v632_v44  ;;  %v661_v2 = vadd.f32 %v658_v13, %v635_v17 }
 0x498   :  { %736 = vst [vmem:[#allocation7 + $0x60] sm:$0xff] %v720_v11  ;;  %738 = vst [vmem:[#allocation7 + $0x70] sm:$0xff] %v722_v33  ;;  %v663_v27 = vadd.f32 %v658_v13, %v637_v19  ;;  %v665_v41 = vadd.f32 %v658_v13, %v639_v23  ;;  %v667_v61 = vadd.f32 %v658_v13, %v641_v25 }
 0x499   :  { %v669_v0 = vadd.f32 %v658_v13, %v643_v29  ;;  %v671_v38 = vadd.f32 %v658_v13, %v645_v50  ;;  %v673_v42 = vadd.f32 %v658_v13, %v647_v48  ;;  %v675_v36 = vadd.f32 %v658_v13, %v649_v40 }
 0x49a   :  { %v677_v35 = vmax.f32 %v661_v2, 0.0  ;;  %v679_v31 = vmax.f32 %v663_v27, 0.0  ;;  %v681_v43 = vmax.f32 %v665_v41, 0.0  ;;  %v683_v47 = vmax.f32 %v667_v61, 0.0 }
 0x49b   :  { %v685_v51 = vmax.f32 %v669_v0, 0.0  ;;  %v687_v55 = vmax.f32 %v671_v38, 0.0  ;;  %v689_v52 = vmax.f32 %v673_v42, 0.0  ;;  %v691_v53 = vmax.f32 %v675_v36, 0.0 }
 0x49c   :  { %v693_v45 = vadd.f32 %v677_v35, %v1056_v5  ;;  %v695_v10 = vadd.f32 %v679_v31, %v1074_v12  ;;  %v697_v54 = vadd.f32 %v681_v43, %v1078_v14  ;;  %v699_v15 = vadd.f32 %v683_v47, %v1086_v18 }
 0x49d   :  { %v701_v56 = vadd.f32 %v685_v51, %v1090_v20  ;;  %v703_v34 = vadd.f32 %v687_v55, %v1098_v24  ;;  %v705_v57 = vadd.f32 %v689_v52, %v1102_v26  ;;  %v707_v37 = vadd.f32 %v691_v53, %v1110_v30 }
 0x49e   :  { %v709_v58 = vmax.f32 %v693_v45, 0.0  ;;  %v711_v28 = vmax.f32 %v695_v10, 0.0  ;;  %v713_v60 = vmax.f32 %v697_v54, 0.0  ;;  %v715_v5 = vmax.f32 %v699_v15, 0.0 }
 0x49f   :  { %v717_v49 = vmax.f32 %v701_v56, 0.0  ;;  %v719_v12 = vmax.f32 %v703_v34, 0.0  ;;  %v721_v62 = vmax.f32 %v705_v57, 0.0  ;;  %v723_v14 = vmax.f32 %v707_v37, 0.0 }
 0x4a0   :  { %725 = vst [vmem:[#allocation7 + $0x8] sm:$0xff] %v709_v58  ;;  %727 = vst [vmem:[#allocation7 + $0x18] sm:$0xff] %v711_v28 }
 0x4a1   :  { %729 = vst [vmem:[#allocation7 + $0x28] sm:$0xff] %v713_v60  ;;  %731 = vst [vmem:[#allocation7 + $0x38] sm:$0xff] %v715_v5 }
 0x4a2   :  { %733 = vst [vmem:[#allocation7 + $0x48] sm:$0xff] %v717_v49  ;;  %735 = vst [vmem:[#allocation7 + $0x58] sm:$0xff] %v719_v12 }
 0x4a3   :  { %737 = vst [vmem:[#allocation7 + $0x68] sm:$0xff] %v721_v62  ;;  %739 = vst [vmem:[#allocation7 + $0x78] sm:$0xff] %v723_v14 }
 0x4a4   :  { %965 = shalt.err (!%p962_p6)
}
 0x4a5   :  { %s966_s24 = scalar_lea.hbm %s1359_s4, 2048 }
 0x4a6   :  { %p967_p7 = scmp.ne.s32.totalorder %s1359_s4, %s966_s24  ;;  %p970_p8 = scmp.lt.u32.totalorder %s966_s24, %s1359_s4 }
 0x4a8   :  { %p972_p9 = pnand %p970_p8, %p967_p7 }
 0x4aa   :  { %975 = shalt.err (!%p972_p9)
}
 0x4ab   :  { %751 = dma.vmem_to_hbm [thread:$0]  %s746_s21, 2048, %s1359_s4, [#allocation4], %s983_s25, %s983_s25, %s984_s26  }
 0x4ac   :  { %980 = dma.done.wait [#allocation4], 2048  }
 0x4ad   :  { %981 = vsyncadd [#allocation4], 4294965248 }
 0x4ae   :  { %755 = vsyncpa [#allocation3], 1 }
 0x4af   :  { %756 = vsyncpa [#allocation6], 1 }
 0x4b0   :  { %757 = vsyncpa [#allocation4], 1 }

</bundles_post_ra>
